<compile_context>
chip_gen: v5e
topology: v5e:2x2
jax: 0.10.0
libtpu: 0.0.40
codegen_flags: <defaults>
</compile_context>

<pallas_src>
import functools

import jax
import jax.numpy as jnp
from jax.experimental import pallas as pl
from jax.experimental.pallas import tpu as pltpu


# ---------------------------------------------------------------------------
# Glue (plain JAX): pooling + normalization + temperature fold + layout
# ---------------------------------------------------------------------------
def _avg_pool_4x4_ceil(x):
    """AvgPool2d(kernel=4, stride=4, padding=0, ceil_mode=True) for NCHW input.

    Partial (ceil-overhang) windows are divided by the number of valid elements,
    matching PyTorch (padding=0, so count_include_pad has no effect).
    """
    k = 4
    B, C, H, W = x.shape
    Ho = -(-H // k)
    Wo = -(-W // k)
    xp = jnp.pad(x, ((0, 0), (0, 0), (0, Ho * k - H), (0, Wo * k - W)))
    s = xp.reshape(B, C, Ho, k, Wo, k).sum(axis=(3, 5))
    cnt_h = jnp.minimum((jnp.arange(Ho) + 1) * k, H) - jnp.arange(Ho) * k
    cnt_w = jnp.minimum((jnp.arange(Wo) + 1) * k, W) - jnp.arange(Wo) * k
    cnt = (cnt_h[:, None] * cnt_w[None, :]).astype(x.dtype)
    return s / cnt


def _prepare_features(feat, temperature, dtype):
    """pool -> L2-normalize over C -> fold 1/sqrt(T) -> (B, C, N) in `dtype`."""
    p = _avg_pool_4x4_ceil(feat)
    norm = jnp.sqrt(jnp.sum(p * p, axis=1, keepdims=True))
    p = p / jnp.maximum(norm, 1e-12)            # F.normalize(p=2, dim=1)
    p = p * (temperature ** -0.5)               # sim/T == (a x) . (a y), a = 1/sqrt(T)
    B, C, Hp, Wp = p.shape
    return p.reshape(B, C, Hp * Wp).astype(dtype)   # channels-first; N on lanes


# ---------------------------------------------------------------------------
# Pallas kernel: one (i, j, row-tile) step of the pairwise softmax-KL
# ---------------------------------------------------------------------------
def _kl_pair_kernel(fS_i_ref, fT_i_ref, fS_j_ref, fT_j_ref, out_ref, acc_ref,
                    *, n_pix, n_pad, tq, inv_t, use_const_shift):
    r = pl.program_id(2)

    @pl.when(r == 0)
    def _():
        acc_ref[...] = jnp.zeros_like(acc_ref)

    fS_i = fS_i_ref[0]          # (C, tq)    bf16 row-slice of image i
    fT_i = fT_i_ref[0]
    fS_j = fS_j_ref[0]          # (C, N_pad) bf16 full image j
    fT_j = fT_j_ref[0]

    # Pair similarity tiles (tq, N_pad): contract over channels, f32 MXU accumulation.
    # TODO(synk): for C >= 128 (MXU-bound regime) feed the i-operand as an (N_pad, C)
    # major copy to rule out a hidden LHS transpose; irrelevant in the small-C regime.
    dn = (((0,), (0,)), ((), ()))
    s_sim = jax.lax.dot_general(fS_i, fS_j, dn, preferred_element_type=jnp.float32)
    t_sim = jax.lax.dot_general(fT_i, fT_j, dn, preferred_element_type=jnp.float32)

    if n_pad > n_pix:
        # Padded pixel columns: force similarity to -1e30 so exp() -> 0 exactly.
        col_valid = jax.lax.broadcasted_iota(jnp.int32, (1, n_pad), 1) < n_pix
        neg = jnp.float32(-1e30)
        s_sim = jnp.where(col_valid, s_sim, neg)
        t_sim = jnp.where(col_valid, t_sim, neg)

    if use_const_shift:
        # |sim/T| <= 1/T for L2-normalized, 1/sqrt(T)-scaled features: constant shift
        # is numerically safe (guarded in the wrapper) and skips two row-max reductions.
        s_shift = s_sim - jnp.float32(inv_t)
        t_shift = t_sim - jnp.float32(inv_t)
    else:
        s_shift = s_sim - jnp.max(s_sim, axis=1, keepdims=True)
        t_shift = t_sim - jnp.max(t_sim, axis=1, keepdims=True)

    s_exp = jnp.exp(s_shift)
    t_exp = jnp.exp(t_shift)
    s_den = jnp.sum(s_exp, axis=1, keepdims=True)          # (tq, 1)
    t_den = jnp.sum(t_exp, axis=1, keepdims=True)          # (tq, 1)

    # KL per row, never materializing p_t / log_p_t / log_p_s:
    #   sum_q p_t (log p_t - log p_s)
    #     = (1/t_den) * sum_q t_exp * (t_shift - s_shift) + log(s_den) - log(t_den)
    inner = jnp.sum(t_exp * (t_shift - s_shift), axis=1, keepdims=True)   # (tq, 1)
    kl_rows = inner / t_den + (jnp.log(s_den) - jnp.log(t_den))           # (tq, 1)

    if n_pad > n_pix:
        # Exclude padded rows from the KL sum.
        row_idx = jax.lax.broadcasted_iota(jnp.int32, (tq, 1), 0) + r * tq
        kl_rows = jnp.where(row_idx < n_pix, kl_rows, jnp.float32(0.0))

    acc_ref[...] += jnp.sum(kl_rows, axis=0, keepdims=True)               # (1, 1)

    # Write the per-pair output block once, after the last row tile (batchmean: /N).
    @pl.when(r == pl.num_programs(2) - 1)
    def _():
        out_ref[...] = jnp.broadcast_to(
            acc_ref[...] * jnp.float32(1.0 / n_pix), out_ref.shape)


# ---------------------------------------------------------------------------
# Wrapper
# ---------------------------------------------------------------------------
def criterion_minibatch_cross_image_pair(feat_S, feat_T, temperature):
    """feat_S, feat_T: (B, C, H, W) float32.  Returns scalar float32 loss."""
    B = feat_S.shape[0]

    # bf16 features: MXU-native matmul inputs, half the VMEM/DMA footprint.
    fS = _prepare_features(feat_S, temperature, jnp.bfloat16)
    fT = _prepare_features(feat_T, temperature, jnp.bfloat16)
    _, C, N = fS.shape

    # Pad the pixel axis to a lane-aligned multiple of 128; padded pixels are
    # masked inside the kernel (zero softmax weight, rows excluded from the KL).
    N_pad = ((N + 127) // 128) * 128
    if N_pad != N:
        fS = jnp.pad(fS, ((0, 0), (0, 0), (0, N_pad - N)))
        fT = jnp.pad(fT, ((0, 0), (0, 0), (0, N_pad - N)))

    # --- generation-aware tiling / VMEM budget -------------------------------
    try:
        vmem_cap = int(getattr(pltpu.get_tpu_info(), "vmem_capacity_bytes", 64 << 20))
    except Exception:
        vmem_cap = 64 << 20                       # conservative fallback (v7x-sized)
    # ~48 MiB on v7x (64 MiB/TC), ~96-100 MiB on v5e/v6e (128 MiB).
    vmem_budget = min((vmem_cap * 3) // 4, 100 << 20)

    def _vmem_need(tq_):
        feat_blocks = 2 * (2 * C * tq_ * 2) + 2 * (2 * C * N_pad * 2)  # bf16, dbl-buffered
        temps = 8 * tq_ * N_pad * 4                                    # live f32 intermediates
        return feat_blocks + temps + (2 << 20)

    tq = 128
    for cand in (512, 256, 128):
        if cand <= N_pad and N_pad % cand == 0 and _vmem_need(cand) <= vmem_budget:
            tq = cand
            break
    assert N_pad % tq == 0, (N_pad, tq)
    num_row_tiles = N_pad // tq

    # Constant-shift softmax is only safe while exp(-2/T) stays well above f32 underflow.
    use_const_shift = (2.0 / float(temperature)) <= 80.0

    kernel = functools.partial(
        _kl_pair_kernel, n_pix=N, n_pad=N_pad, tq=tq,
        inv_t=1.0 / float(temperature), use_const_shift=use_const_shift)

    # Per-image / per-row-tile windows expressed as BlockSpecs -> pipelined DMA,
    # O(C*N) resident footprint instead of all B images.
    spec_i = pl.BlockSpec((1, C, tq), lambda i, j, r: (i, 0, r))
    spec_j = pl.BlockSpec((1, C, N_pad), lambda i, j, r: (j, 0, 0))
    # Per-pair, (8,128)-aligned output block -> race-free 'parallel' pair axes.
    out_spec = pl.BlockSpec((1, 1, 8, 128), lambda i, j, r: (i, j, 0, 0))

    out = pl.pallas_call(
        kernel,
        out_shape=jax.ShapeDtypeStruct((B, B, 8, 128), jnp.float32),
        grid_spec=pltpu.PrefetchScalarGridSpec(
            num_scalar_prefetch=0,
            grid=(B, B, num_row_tiles),
            in_specs=[spec_i, spec_i, spec_j, spec_j],
            out_specs=out_spec,
            scratch_shapes=[pltpu.VMEM((1, 1), jnp.float32)],
        ),
        compiler_params=pltpu.CompilerParams(
            dimension_semantics=("parallel", "parallel", "arbitrary"),
            vmem_limit_bytes=int(vmem_budget),
        ),
    )(fS, fT, fS, fT)

    return jnp.sum(out[:, :, 0, 0]) / jnp.float32(B * B)


# ---------------------------------------------------------------------------
# Pure-JAX reference (for correctness checks)
# ---------------------------------------------------------------------------
def _pairwise_kl_reference(fS, fT):
    """Reference pairwise softmax-KL on already-prepared (B, C, N) features."""
    B, _, N = fS.shape
    dn = (((0,), (0,)), ((), ()))
    total = jnp.float32(0.0)
    for i in range(B):
        for j in range(B):
            s = jax.lax.dot_general(fS[i], fS[j], dn, preferred_element_type=jnp.float32)
            t = jax.lax.dot_general(fT[i], fT[j], dn, preferred_element_type=jnp.float32)
            log_p_s = jax.nn.log_softmax(s, axis=1)
            log_p_t = jax.nn.log_softmax(t, axis=1)
            p_t = jnp.exp(log_p_t)
            total = total + jnp.sum(p_t * (log_p_t - log_p_s)) / N
    return total / (B * B)


if __name__ == "__main__":
    key = jax.random.PRNGKey(0)
    k1, k2 = jax.random.split(key)
    B, C, H, W = 2, 4, 16, 16
    feat_S = jax.random.normal(k1, (B, C, H, W), dtype=jnp.float32)
    feat_T = jax.random.normal(k2, (B, C, H, W), dtype=jnp.float32)
    temperature = 0.1

    out = criterion_minibatch_cross_image_pair(feat_S, feat_T, temperature)
    out = jax.block_until_ready(out)

    # Tight check: reference using the same bf16 feature quantization as the kernel
    # (isolates the in-kernel math from the intentional bf16 cast).
    ref_bf16 = _pairwise_kl_reference(
        _prepare_features(feat_S, temperature, jnp.bfloat16),
        _prepare_features(feat_T, temperature, jnp.bfloat16))
    # Looser check: full-f32 reference mirroring the PyTorch module's numerics.
    ref_f32 = _pairwise_kl_reference(
        _prepare_features(feat_S, temperature, jnp.float32),
        _prepare_features(feat_T, temperature, jnp.float32))

    assert jnp.allclose(out, ref_bf16, rtol=1e-2, atol=1e-3), (out, ref_bf16)
    assert jnp.allclose(out, ref_f32, rtol=1e-1, atol=2e-2), (out, ref_f32)
    print("KERNEL_OK")
</pallas_src>

<mosaic_0001>
module attributes {stable_mosaic.version = 11 : i64} {
  func.func @_kl_pair_kernel(%arg0: i32, %arg1: i32, %arg2: i32, %arg3: memref<1x4x128xbf16, #tpu.memory_space<vmem>>, %arg4: memref<1x4x128xbf16, #tpu.memory_space<vmem>>, %arg5: memref<1x4x128xbf16, #tpu.memory_space<vmem>>, %arg6: memref<1x4x128xbf16, #tpu.memory_space<vmem>>, %arg7: memref<1x1x8x128xf32, #tpu.memory_space<vmem>>, %arg8: memref<1x1xf32, #tpu.memory_space<vmem>>) attributes {dimension_semantics = [#tpu.dimension_semantics<parallel>, #tpu.dimension_semantics<parallel>, #tpu.dimension_semantics<arbitrary>], iteration_bounds = array<i64: 2, 2, 1>, scalar_prefetch = 0 : i64, scratch_operands = 1 : i64, tpu.core_type = #tpu.core_type<tc>, window_params = [{transform_indices = @transform_0, window_bounds = array<i64: 1, 4, 128>}, {transform_indices = @transform_1, window_bounds = array<i64: 1, 4, 128>}, {transform_indices = @transform_2, window_bounds = array<i64: 1, 4, 128>}, {transform_indices = @transform_3, window_bounds = array<i64: 1, 4, 128>}, {transform_indices = @transform_4, window_bounds = array<i64: 1, 1, 8, 128>}]} {
    %c0_i32 = arith.constant 0 : i32
    %0 = arith.cmpi eq, %arg2, %c0_i32 : i32
    %1 = arith.extui %0 : i1 to i32
    %c0_i32_0 = arith.constant 0 : i32
    %2 = arith.cmpi ne, %1, %c0_i32_0 : i32
    scf.if %2 {
      %cst_29 = arith.constant 0.000000e+00 : f32
      %59 = vector.broadcast %cst_29 : f32 to vector<1x1xf32>
      %c0_30 = arith.constant 0 : index
      %c0_31 = arith.constant 0 : index
      %60 = vector.load %arg8[%c0_30, %c0_31] : memref<1x1xf32, #tpu.memory_space<vmem>>, vector<1x1xf32>
      tpu.vector_store %arg8[%c0_30, %c0_31], %59 {strides = array<i32>} : memref<1x1xf32, #tpu.memory_space<vmem>>, vector<1x1xf32>,
    } else {
    }
    %c0 = arith.constant 0 : index
    %c0_1 = arith.constant 0 : index
    %c0_2 = arith.constant 0 : index
    %3 = vector.load %arg3[%c0, %c0_1, %c0_2] : memref<1x4x128xbf16, #tpu.memory_space<vmem>>, vector<1x4x128xbf16>
    %4 = vector.shape_cast %3 : vector<1x4x128xbf16> to vector<4x128xbf16>
    %c0_3 = arith.constant 0 : index
    %c0_4 = arith.constant 0 : index
    %c0_5 = arith.constant 0 : index
    %5 = vector.load %arg4[%c0_3, %c0_4, %c0_5] : memref<1x4x128xbf16, #tpu.memory_space<vmem>>, vector<1x4x128xbf16>
    %6 = vector.shape_cast %5 : vector<1x4x128xbf16> to vector<4x128xbf16>
    %c0_6 = arith.constant 0 : index
    %c0_7 = arith.constant 0 : index
    %c0_8 = arith.constant 0 : index
    %7 = vector.load %arg5[%c0_6, %c0_7, %c0_8] : memref<1x4x128xbf16, #tpu.memory_space<vmem>>, vector<1x4x128xbf16>
    %8 = vector.shape_cast %7 : vector<1x4x128xbf16> to vector<4x128xbf16>
    %c0_9 = arith.constant 0 : index
    %c0_10 = arith.constant 0 : index
    %c0_11 = arith.constant 0 : index
    %9 = vector.load %arg6[%c0_9, %c0_10, %c0_11] : memref<1x4x128xbf16, #tpu.memory_space<vmem>>, vector<1x4x128xbf16>
    %10 = vector.shape_cast %9 : vector<1x4x128xbf16> to vector<4x128xbf16>
    %cst = arith.constant dense<0.000000e+00> : vector<128x128xf32>
    %11 = tpu.matmul %4, %8, %cst {dimension_numbers = #tpu.dot_dimension_numbers<[0], [0], [1], [1], [0, 1, 1, 1], [], []>} : vector<4x128xbf16>, vector<4x128xbf16>, vector<128x128xf32> -> vector<128x128xf32>
    %cst_12 = arith.constant dense<0.000000e+00> : vector<128x128xf32>
    %12 = tpu.matmul %6, %10, %cst_12 {dimension_numbers = #tpu.dot_dimension_numbers<[0], [0], [1], [1], [0, 1, 1, 1], [], []>} : vector<4x128xbf16>, vector<4x128xbf16>, vector<128x128xf32> -> vector<128x128xf32>
    %13 = tpu.iota {dimensions = array<i32: 1>} : vector<1x128xi32>
    %c16_i32 = arith.constant 16 : i32
    %14 = vector.broadcast %c16_i32 : i32 to vector<1x128xi32>
    %15 = arith.cmpi slt, %13, %14 : vector<1x128xi32>
    %cst_13 = arith.constant -1.000000e+30 : f32
    %16 = vector.shape_cast %15 : vector<1x128xi1> to vector<1x128xi1>
    %17 = vector.broadcast %16 : vector<1x128xi1> to vector<128x128xi1>
    %18 = vector.broadcast %cst_13 : f32 to vector<128x128xf32>
    %19 = arith.select %17, %11, %18 : vector<128x128xi1>, vector<128x128xf32>
    %cst_14 = arith.constant -1.000000e+30 : f32
    %20 = vector.shape_cast %15 : vector<1x128xi1> to vector<1x128xi1>
    %21 = vector.broadcast %20 : vector<1x128xi1> to vector<128x128xi1>
    %22 = vector.broadcast %cst_14 : f32 to vector<128x128xf32>
    %23 = arith.select %21, %12, %22 : vector<128x128xi1>, vector<128x128xf32>
    %cst_15 = arith.constant 1.000000e+01 : f32
    %24 = vector.broadcast %cst_15 : f32 to vector<128x128xf32>
    %25 = arith.subf %19, %24 : vector<128x128xf32>
    %cst_16 = arith.constant 1.000000e+01 : f32
    %26 = vector.broadcast %cst_16 : f32 to vector<128x128xf32>
    %27 = arith.subf %23, %26 : vector<128x128xf32>
    %28 = math.exp %25 : vector<128x128xf32>
    %29 = math.exp %27 : vector<128x128xf32>
    %cst_17 = arith.constant dense<0.000000e+00> : vector<128xf32>
    %30 = vector.multi_reduction <add>, %28, %cst_17 [1] : vector<128x128xf32> to vector<128xf32>
    %31 = vector.shape_cast %30 : vector<128xf32> to vector<128x1xf32>
    %cst_18 = arith.constant dense<0.000000e+00> : vector<128xf32>
    %32 = vector.multi_reduction <add>, %29, %cst_18 [1] : vector<128x128xf32> to vector<128xf32>
    %33 = vector.shape_cast %32 : vector<128xf32> to vector<128x1xf32>
    %34 = arith.subf %27, %25 : vector<128x128xf32>
    %35 = arith.mulf %29, %34 : vector<128x128xf32>
    %cst_19 = arith.constant dense<0.000000e+00> : vector<128xf32>
    %36 = vector.multi_reduction <add>, %35, %cst_19 [1] : vector<128x128xf32> to vector<128xf32>
    %37 = vector.shape_cast %36 : vector<128xf32> to vector<128x1xf32>
    %38 = arith.divf %37, %33 : vector<128x1xf32>
    %39 = math.log %31 : vector<128x1xf32>
    %40 = math.log %33 : vector<128x1xf32>
    %41 = arith.subf %39, %40 : vector<128x1xf32>
    %42 = arith.addf %38, %41 : vector<128x1xf32>
    %43 = tpu.iota {dimensions = array<i32: 0>} : vector<128x1xi32>
    %c128_i32 = arith.constant 128 : i32
    %44 = arith.muli %arg2, %c128_i32 : i32
    %45 = vector.broadcast %44 : i32 to vector<128x1xi32>
    %46 = arith.addi %43, %45 : vector<128x1xi32>
    %c16_i32_20 = arith.constant 16 : i32
    %47 = vector.broadcast %c16_i32_20 : i32 to vector<128x1xi32>
    %48 = arith.cmpi slt, %46, %47 : vector<128x1xi32>
    %cst_21 = arith.constant 0.000000e+00 : f32
    %49 = vector.broadcast %cst_21 : f32 to vector<128x1xf32>
    %50 = arith.select %48, %42, %49 : vector<128x1xi1>, vector<128x1xf32>
    %c0_22 = arith.constant 0 : index
    %c0_23 = arith.constant 0 : index
    %51 = vector.load %arg8[%c0_22, %c0_23] : memref<1x1xf32, #tpu.memory_space<vmem>>, vector<1x1xf32>
    %cst_24 = arith.constant dense<0.000000e+00> : vector<1xf32>
    %52 = vector.multi_reduction <add>, %50, %cst_24 [0] : vector<128x1xf32> to vector<1xf32>
    %53 = vector.shape_cast %52 : vector<1xf32> to vector<1x1xf32>
    %54 = arith.addf %51, %53 : vector<1x1xf32>
    %c0_25 = arith.constant 0 : index
    %c0_26 = arith.constant 0 : index
    %55 = vector.load %arg8[%c0_25, %c0_26] : memref<1x1xf32, #tpu.memory_space<vmem>>, vector<1x1xf32>
    tpu.vector_store %arg8[%c0_25, %c0_26], %54 {strides = array<i32>} : memref<1x1xf32, #tpu.memory_space<vmem>>, vector<1x1xf32>,
    %c0_i32_27 = arith.constant 0 : i32
    %56 = arith.cmpi eq, %arg2, %c0_i32_27 : i32
    %57 = arith.extui %56 : i1 to i32
    %c0_i32_28 = arith.constant 0 : i32
    %58 = arith.cmpi ne, %57, %c0_i32_28 : i32
    scf.if %58 {
      %c0_29 = arith.constant 0 : index
      %c0_30 = arith.constant 0 : index
      %59 = vector.load %arg8[%c0_29, %c0_30] : memref<1x1xf32, #tpu.memory_space<vmem>>, vector<1x1xf32>
      %cst_31 = arith.constant 6.250000e-02 : f32
      %60 = vector.broadcast %cst_31 : f32 to vector<1x1xf32>
      %61 = arith.mulf %59, %60 : vector<1x1xf32>
      %62 = vector.shape_cast %61 : vector<1x1xf32> to vector<1x1x1x1xf32>
      %63 = vector.broadcast %62 : vector<1x1x1x1xf32> to vector<1x1x8x128xf32>
      %c0_32 = arith.constant 0 : index
      %c0_33 = arith.constant 0 : index
      %c0_34 = arith.constant 0 : index
      %c0_35 = arith.constant 0 : index
      %64 = vector.load %arg7[%c0_32, %c0_33, %c0_34, %c0_35] : memref<1x1x8x128xf32, #tpu.memory_space<vmem>>, vector<1x1x8x128xf32>
      tpu.vector_store %arg7[%c0_32, %c0_33, %c0_34, %c0_35], %63 {strides = array<i32>} : memref<1x1x8x128xf32, #tpu.memory_space<vmem>>, vector<1x1x8x128xf32>,
    } else {
    }
    return
  }
  func.func @transform_0(%arg0: i32, %arg1: i32, %arg2: i32) -> (i32, i32, i32) {
    %c0_i32 = arith.constant 0 : i32
    %c0_i32_0 = arith.constant 0 : i32
    return %arg0, %c0_i32, %arg2 : i32, i32, i32
  }
  func.func @transform_1(%arg0: i32, %arg1: i32, %arg2: i32) -> (i32, i32, i32) {
    %c0_i32 = arith.constant 0 : i32
    %c0_i32_0 = arith.constant 0 : i32
    return %arg0, %c0_i32, %arg2 : i32, i32, i32
  }
  func.func @transform_2(%arg0: i32, %arg1: i32, %arg2: i32) -> (i32, i32, i32) {
    %c0_i32 = arith.constant 0 : i32
    %c0_i32_0 = arith.constant 0 : i32
    %c0_i32_1 = arith.constant 0 : i32
    return %arg1, %c0_i32, %c0_i32_0 : i32, i32, i32
  }
  func.func @transform_3(%arg0: i32, %arg1: i32, %arg2: i32) -> (i32, i32, i32) {
    %c0_i32 = arith.constant 0 : i32
    %c0_i32_0 = arith.constant 0 : i32
    %c0_i32_1 = arith.constant 0 : i32
    return %arg1, %c0_i32, %c0_i32_0 : i32, i32, i32
  }
  func.func @transform_4(%arg0: i32, %arg1: i32, %arg2: i32) -> (i32, i32, i32, i32) {
    %c0_i32 = arith.constant 0 : i32
    %c0_i32_0 = arith.constant 0 : i32
    %c0_i32_1 = arith.constant 0 : i32
    return %arg0, %arg1, %c0_i32, %c0_i32_0 : i32, i32, i32, i32
  }
}

</mosaic_0001>

<bundles_post_ra>
// kernel: tpu_custom_call.1
= control target key start
LH: loop header
LB: loop body
LE: loop exit
PB: predicated region body
PF: predicated region fallthrough
CT: control target
= control target key end

     0   :  { %s2283_s0 = inlined_call_operand.hbm [shape: bf16[2,4,128], index: 0, kind: input, shape index: {}]   ;;  %s2284_s1 = inlined_call_operand.hbm [shape: bf16[2,4,128], index: 1, kind: input, shape index: {}]   ;;  %s2285_s2 = inlined_call_operand.hbm [shape: bf16[2,4,128], index: 2, kind: input, shape index: {}]   ;;  %s2286_s3 = inlined_call_operand.hbm [shape: bf16[2,4,128], index: 3, kind: input, shape index: {}]   ;;  %s2287_s4 = inlined_call_operand.hbm [shape: f32[2,2,8,128], index: 4, kind: output, shape index: {}]  }
   0x1   :  { %2298 = sst [smem:[#allocation29_spill]] %s2283_s0 }
   0x2   :  { %2299 = sst [smem:[#allocation30_spill]] %s2284_s1 }
   0x3   :  { %2300 = sst [smem:[#allocation31_spill]] %s2287_s4 }
   0x4   :  { %9 = vsyncpa [#allocation4], 0 }
   0x5   :  { %11 = vsyncpa [#allocation4 + $0x1], 0 }
   0x6   :  { %12 = vsyncpa [#allocation7], 0 }
   0x7   :  { %14 = vsyncpa [#allocation7 + $0x1], 0 }
   0x8   :  { %15 = vsyncpa [#allocation10], 0 }
   0x9   :  { %17 = vsyncpa [#allocation10 + $0x1], 0 }
   0xa   :  { %18 = vsyncpa [#allocation5], 0 }
   0xb   :  { %20 = vsyncpa [#allocation5 + $0x1], 0  ;;  %s1988_s15 = smov 0   ;;  %s1990_s16 = smov 0  }
   0xc   :  { %s1992_s17 = smov 0   ;;  %s1994_s18 = smov 0  }
   0xd   :  { %s1996_s19 = smov 0   ;;  %s1998_s20 = smov 0  }
   0xe   :  { %s2000_s21 = smov 0   ;;  %s2002_s22 = smov 0  }
   0xf   :  { %s2004_s23 = smov 0   ;;  %s2006_s24 = smov 0  }
  0x10   :  { %s2008_s25 = smov 0   ;;  %s2010_s26 = smov 0  }
  0x11   :  { %s2012_s27 = smov 0   ;;  %s2014_s28 = smov 0  }
  0x12 LB: > { %2301 = sst [smem:[#allocation17_spill]] %s1907_s15  ;;  %s2055_s29 = sadd.s32 4294967295, %s1959_s28   ;;  %s1959_s28 = sphi %s2014_s28, %s26_s28   ;;  %s1955_s27 = sphi %s2012_s27, %s2342_s27   ;;  %s1951_s26 = sphi %s2010_s26, %s2341_s26   ;;  %s1947_s25 = sphi %s2008_s25, %s2340_s25   ;;  %s1943_s24 = sphi %s2006_s24, %s2339_s24   ;;  %s1939_s23 = sphi %s2004_s23, %s2349_s23   ;;  %s1935_s22 = sphi %s2002_s22, %s2348_s22   ;;  %s1931_s21 = sphi %s2000_s21, %s2347_s21   ;;  %s1927_s20 = sphi %s1998_s20, %s2337_s20   ;;  %s1923_s19 = sphi %s1996_s19, %s2336_s19   ;;  %s1919_s18 = sphi %s1994_s18, %s2335_s18   ;;  %s1915_s17 = sphi %s1992_s17, %s2346_s17   ;;  %s1911_s16 = sphi %s1990_s16, %s2345_s16   ;;  %s1907_s15 = sphi %s1988_s15, %s2344_s15  }
  0x13   : > { %2302 = sst [smem:[#allocation18_spill]] %s1923_s19  ;;  %p61_p0 = scmp.ne.s32.totalorder %s1939_s23, %s1935_s22 }
  0x14   : > { %2303 = sst [smem:[#allocation19_spill]] %s1927_s20  ;;  %p62_p1 = scmp.eq.s32.totalorder %s1959_s28, 0 }
  0x15   : > { %2304 = sst [smem:[#allocation20_spill]] %s1943_s24  ;;  %p67_p2 = scmp.ne.s32.totalorder %s1935_s22, %s1931_s21 }
  0x16   : > { %2305 = sst [smem:[#allocation21_spill]] %s1947_s25  ;;  %p68_p3 = scmp.eq.s32.totalorder %s2055_s29, 0 }
  0x17   : > { %2306 = sst [smem:[#allocation22_spill]] %s1951_s26  ;;  %p115_p4 = scmp.ne.s32.totalorder %s1927_s20, %s1923_s19 }
  0x18   : > { %2307 = sst [smem:[#allocation23_spill]] %s1955_s27  ;;  %p63_p5 = por %p62_p1, %p61_p0 }
  0x19   : > { %p121_p6 = scmp.ne.s32.totalorder %s1923_s19, %s1919_s18  ;;  %p2067_p7 = por %p68_p3, %p67_p2 }
  0x1a   : > { %p2071_p8 = por %p115_p4, %p62_p1  ;;  %p173_p10 = scmp.eq.s32.totalorder %s2055_s29, 3 }
  0x1b   : > { %p2075_p9 = por %p121_p6, %p68_p3  ;;  %p1526_p11 = scmp.lt.s32.totalorder %s1959_s28, 4 }
  0x1c   : > { %s199_s9 = sand.u32 1, %s1939_s23   ;;  %s1431_s10 = sshll.u32 %s1955_s27, 1 }
  0x1d   : > { %s2310_s8 = scalar_select %p2075_p9, 1, 0 }
  0x1e   : > { %s1430_s11 = sshll.u32 %s199_s9, 1  ;;  %p2083_p12 = pnand %p1526_p11, %p63_p5 }
  0x1f   : > { %2311 = sst [smem:[#allocation24_spill]] %s2310_s8  ;;  %s219_s13 = sand.u32 1, %s1959_s28  }
  0x20   : > { %s2313_s1 = sld [smem:[#allocation30_spill]]  ;;  %s223_s5 = scalar_lea.vmem [#allocation6], %s1430_s11 }
  0x21   : > { %s232_s30 = sshll.u32 %s223_s5, 4  ;;  %p2093_p13 = pnand %p1526_p11, %p2071_p8  ;;  %s233_s30 = int_to_ptr.vmem [resolvable:$true] %s232_s30 }
  0x22   : > { %s2097_s25 = scalar_lea.sflag [#allocation7], %s219_s13  ;;  %p1438_p0 = scmp.ge.s32.totalorder %s1959_s28, 1 }
  0x23   : > { %p275_p1 = scmp.lt.s32.totalorder %s1959_s28, 5  ;;  %s2316_s0 = sld [smem:[#allocation29_spill]] }
  0x24   : > { %s203_s13 = scalar_lea.vmem [#allocation3], %s1430_s11  ;;  %s41_s8 = sadd.s32 1, %s1951_s26 }
  0x25   : > { %p2104_p2 = pnand %p1438_p0, %p275_p1  ;;  %s108_s19 = sadd.s32 1, %s1927_s20 }
  0x26   : > { %s228_s21 = scalar_lea.hbm %s2313_s1, %s1431_s10  ;;  %s1427_s1 = sadd.s32 4294967294, %s1959_s28  }
  0x27   : > { %s230_s4 = sshll.u32 %s228_s21, 4  ;;  %s200_s21 = scalar_lea.sflag [#allocation4], %s199_s9  ;;  %s231_s4 = int_to_ptr.hbm [resolvable:$true] %s230_s4 }
  0x28   : > { %1515 = dma.hbm_to_vmem [thread:$0]  (!%p2083_p12), %s231_s4, 32, %s233_s30, %s2097_s25  }
  0x29   : > { %s208_s18 = scalar_lea.hbm %s2316_s0, %s1431_s10  ;;  %s212_s4 = sshll.u32 %s203_s13, 4  ;;  %s213_s4 = int_to_ptr.vmem [resolvable:$true] %s212_s4 }
  0x2a   : > { %s210_s30 = sshll.u32 %s208_s18, 4  ;;  %p43_p3 = scmp.ge.s32.totalorder %s41_s8, 2  ;;  %s211_s30 = int_to_ptr.hbm [resolvable:$true] %s210_s30 }
  0x2b   : > { %1512 = dma.hbm_to_vmem [thread:$0]  (!%p2083_p12), %s211_s30, 32, %s213_s4, %s200_s21  }
  0x2c   : > { %s162_s10 = sadd.s32 1, %s1915_s17  ;;  %p172_p4 = scmp.ne.s32.totalorder %s1915_s17, %s1911_s16 }
  0x2d   : > { %p178_p5 = scmp.ne.s32.totalorder %s1911_s16, %s1907_s15  ;;  %s2351_s8 = smov (%p43_p3, %s41_s8), 0 }
  0x2e   : > { %2317 = sst [smem:[#allocation25_spill]] %s2351_s8  ;;  %s2318_s11 = sadd.s32 1, %s1955_s27 }
  0x2f   : > { %s2353_s11 = smov (!%p43_p3, %s2318_s11), %s1955_s27  ;;  %s105_s9 = ssub.s32 %s1951_s26, %s2351_s8 }
  0x30   : > { %p2130_p6 = por %p173_p10, %p172_p4  ;;  %p47_p8 = scmp.ge.s32.totalorder %s2353_s11, 2 }
  0x31   : > { %p106_p11 = scmp.eq.s32.totalorder %s105_s9, 0  ;;  %p179_p12 = scmp.eq.s32.totalorder %s1427_s1, 3 }
  0x32   : > { %s241_s7 = sand.u32 1, %s1927_s20   ;;  %s2355_s11 = smov (%p47_p8, %s2353_s11), 0 }
  0x33   : > { %2320 = sst [smem:[#allocation26_spill]] %s2355_s11  ;;  %s49_s18 = ssub.s32 %s1955_s27, %s2355_s11 }
  0x34   : > { %s2138_s14 = scalar_select %p106_p11, %s1927_s20, %s108_s19  }
  0x35   : > { %p2142_p0 = por %p179_p12, %p178_p5  ;;  %p52_p10 = scmp.eq.s32.totalorder %s49_s18, 0 }
  0x36   : > { %2321 = sst [smem:[#allocation27_spill]] %s2138_s14  ;;  %s159_s4 = sor.u32 %s105_s9, %s49_s18 }
  0x37   : > { %p160_p1 = scmp.eq.s32.totalorder %s159_s4, 0  ;;  %s1434_s30 = sshll.u32 %s241_s7, 1 }
  0x38   : > { %s2323_s21 = sadd.s32 1, %s1939_s23  ;;  %s1435_s8 = sshll.u32 %s1951_s26, 1 }
  0x39   : > { %s2149_s0 = scalar_select %p52_p10, %s1939_s23, %s2323_s21  }
  0x3a   : > { %s2152_s1 = scalar_select %p160_p1, %s1915_s17, %s162_s10  }
  0x3b   : > { %2324 = sst [smem:[#allocation28_spill]] %s2149_s0  ;;  %s247_s20 = scalar_lea.hbm %s2285_s2, %s1435_s8 }
  0x3c   : > { %s243_s11 = scalar_lea.vmem [#allocation8], %s1434_s30  ;;  %s249_s15 = sshll.u32 %s247_s20, 4  ;;  %s250_s15 = int_to_ptr.hbm [resolvable:$true] %s249_s15 }
  0x3d   : > { %s251_s27 = sshll.u32 %s243_s11, 4  ;;  %s266_s4 = scalar_lea.hbm %s2286_s3, %s1435_s8  ;;  %s252_s27 = int_to_ptr.vmem [resolvable:$true] %s251_s27 }
  0x3e   : > { %1518 = dma.hbm_to_vmem [thread:$0]  (!%p2093_p13), %s250_s15, 32, %s252_s27, %s2097_s25  }
  0x3f   : > { %s268_s21 = sshll.u32 %s266_s4, 4  ;;  %s262_s10 = scalar_lea.vmem [#allocation9], %s1434_s30  ;;  %s269_s21 = int_to_ptr.hbm [resolvable:$true] %s268_s21 }
  0x40   : > { %s270_s0 = sshll.u32 %s262_s10, 4  ;;  %s259_s26 = scalar_lea.sflag [#allocation10], %s241_s7  ;;  %s271_s0 = int_to_ptr.vmem [resolvable:$true] %s270_s0 }
  0x41   : > { %1521 = dma.hbm_to_vmem [thread:$0]  (!%p2093_p13), %s269_s21, 32, %s271_s0, %s259_s26  }
  0x42   : > { %279 = sbr.rel (%p2104_p2) target bundleno = 668 (0x29c), region = 36  ;;  %s281_s20 = sand.u32 (!%p2104_p2), 1, %s1935_s22  }
  0x43   : > { %s1439_s11 = sshll.u32 (!%p2104_p2), %s281_s20, 1  ;;  %s282_s15 = scalar_lea.sflag (!%p2104_p2), [#allocation4], %s281_s20 }
  0x44   : > { %s285_s25 = scalar_lea.vmem (!%p2104_p2), [#allocation3], %s1439_s11 }
  0x47   : > { %1886 = dma.done.wait (%p2067_p7), %s282_s15, 32  }
  0x48   : > { %1888 = vsyncadd (%p2067_p7), %s282_s15, 4294967264  ;;  %s291_s27 = sand.u32 1, %s2055_s29   ;;  %s295_s24 = scalar_lea.vmem [#allocation6], %s1439_s11 }
  0x49   : > { %s292_s8 = scalar_lea.sflag [#allocation7], %s291_s27 }
  0x4a   : > { %1890 = dma.done.wait (%p2067_p7), %s292_s8, 32  }
  0x4b   : > { %1892 = vsyncadd (%p2067_p7), %s292_s8, 4294967264  ;;  %s2325_s0 = sld [smem:[#allocation18_spill]] }
  0x51   : > { %s303_s5 = sand.u32 1, %s2325_s0  }
  0x52   : > { %s1441_s7 = sshll.u32 %s303_s5, 1 }
  0x53   : > { %s305_s14 = scalar_lea.vmem [#allocation8], %s1441_s7 }
  0x54   : > { %1894 = dma.done.wait (%p2075_p9), %s292_s8, 32  }
  0x55   : > { %1896 = vsyncadd (%p2075_p9), %s292_s8, 4294967264  ;;  %s312_s30 = scalar_lea.sflag [#allocation10], %s303_s5  ;;  %s315_s29 = scalar_lea.vmem [#allocation9], %s1441_s7 }
  0x56   : > { %1898 = dma.done.wait (%p2075_p9), %s312_s30, 32  }
  0x57   : > { %1900 = vsyncadd (%p2075_p9), %s312_s30, 4294967264  ;;  %vm361_vm0 = vcmask 0   ;;  %v1961_v0 = vmov 0.0   ;;  %vm408_vm1 = vcmask 1041408   ;;  %v363_v1 = vld [vmem:[%s285_s25] sm:$0x3]  ;;  %v553_v10 = vlaneseq }
  0x58   : > { %362 = vst.msk [vmem:[#allocation2] sm:$0x1] %vm361_vm0, %v1961_v0  ;;  %v364_v2 = vld [vmem:[%s295_s24] sm:$0x3]  ;;  %v366_v3 = vld [vmem:[%s315_s29] sm:$0x3] }
  0x59   : > { %1642 = vxpose.binary.xlu0.c.b16.start.end [1/2] (short) %v363_v1, %v364_v2, 128  ;;  %v502_v4 = vsel %vm408_vm1, %v366_v3, 0  ;;  %v365_v5 = vld [vmem:[%s305_s14] sm:$0x3]  ;;  %vm383_vm2 = vcmask 31744   ;;  %v554_v12 = vand.u32 127, %v553_v10  ;;  %v1962_v2 = vmov 0  }
  0x5a   : > { %511 = vmatpush.bf16.msra.mxu1 %v502_v4  ;;  %1498 = vmatpush.bf16.msra.mxu3 %v502_v4  ;;  %v410_v6 = vsel %vm408_vm1, %v365_v5, 0  ;;  %s2329_s6 = sld [smem:[#allocation21_spill]]  ;;  %s353_s18 = sand.u32 1, %s1911_s16  }
  0x5b   : > { %419 = vmatpush.bf16.msra.mxu0 %v410_v6  ;;  %1497 = vmatpush.bf16.msra.mxu2 %v410_v6  ;;  %vm555_vm3 = vcmp.lt.s32.totalorder %v554_v12, 16  ;;  %s2330_s19 = sld [smem:[#allocation20_spill]]  ;;  %s1443_s21 = sshll.u32 %s353_s18, 3 }
  0x5c   : > { %1659 = vset.pattern.permute.xlu2 %v1962_v2  ;;  %s2331_s15 = sld [smem:[#allocation31_spill]]  ;;  %s355_s27 = scalar_lea.vmem [#allocation11], %s1443_s21 }
  0x5d   : > { %s1269_s24 = sshll.u32 %s355_s27, 4  ;;  %s1255_s26 = scalar_lea.sflag [#allocation5], %s353_s18  ;;  %s1270_s24 = int_to_ptr.vmem [resolvable:$true] %s1269_s24 }
  0x60   : > { %s1493_s9 = sshll.u32 %s2329_s6, 1 }
  0x61   : > { %s1265_s4 = sadd.s32 %s2330_s19, %s1493_s9 }
  0x62   : > { %s1494_s10 = sshll.u32 %s1265_s4, 3  ;;  %s2332_s8 = smov %s2331_s15 }
  0x63   : > { %s1267_s25 = scalar_lea.hbm %s2331_s15, %s1494_s10  ;;  %s1821_s29 = scalar_lea.hbm %s2332_s8, 32 }
  0x64   : > { %s1271_s0 = sshll.u32 %s1267_s25, 4  ;;  %s1272_s0 = int_to_ptr.hbm [resolvable:$true] %s1271_s0 }
  0x65   : > { %s1815_s5 = sshra.s32 %s1272_s0, 4  ;;  %s1816_s5 = int_to_ptr.hbm [resolvable:$true] %s1815_s5 }
  0x66   : > { %s1817_s7 = scalar_lea.hbm %s1816_s5, 8  ;;  %p1822_p2 = scmp.lt.s32.totalorder %s1816_s5, %s2332_s8 }
  0x67   : > { %p1818_p7 = scmp.ne.s32.totalorder %s1816_s5, %s1817_s7  ;;  %p1823_p3 = scmp.lt.s32.totalorder %s1821_s29, %s1817_s7 }
  0x69   : > { %p1819_p9 = pnand %p1818_p7, %p2130_p6  ;;  %p1824_p4 = por %p1823_p3, %p1822_p2 }
  0x6b   : > { %p1820_p13 = pneg %p1819_p9 }
  0x6d   : > { %p1825_p5 = pnand %p1824_p4, %p1820_p13 }
  0xc0   : > { %1660 = vset.pattern.permute.xlu0 %v1962_v2 }
 0x105   : > { %v1643_v7 = vpop.trf.xlu0 }
 0x106   : > { %1452 = vmatmul.msk.bf16.vlgmr.msra.gmra.mxu1 %vm383_vm2, %v1643_v7 }
 0x10d   : > { %v1644_v8 = vpop.trf.xlu0 }
 0x10e   : > { %1444 = vmatmul.msk.bf16.vlgmr.msra.gmra.mxu0 %vm383_vm2, %v1644_v8 }
 0x115   : > { %v1645_v9 = vpop.trf.xlu0 }
 0x116   : > { %1453 = vmatmul.msk.bf16.gmra.mxu1 %vm383_vm2, %v1645_v9 }
 0x11d   : > { %v1646_v11 = vpop.trf.xlu0 }
 0x11e   : > { %1445 = vmatmul.msk.bf16.gmra.mxu0 %vm383_vm2, %v1646_v11 }
 0x125   : > { %v1647_v15 = vpop.trf.xlu0 }
 0x126   : > { %1454 = vmatmul.msk.bf16.gmra.mxu1 %vm383_vm2, %v1647_v15 }
 0x12d   : > { %v1648_v21 = vpop.trf.xlu0 }
 0x12e   : > { %1446 = vmatmul.msk.bf16.gmra.mxu0 %vm383_vm2, %v1648_v21 }
 0x135   : > { %v1649_v29 = vpop.trf.xlu0 }
 0x136   : > { %1455 = vmatmul.msk.bf16.gmra.mxu1 %vm383_vm2, %v1649_v29 }
 0x13d   : > { %v1650_v34 = vpop.trf.xlu0 }
 0x13e   : > { %1447 = vmatmul.msk.bf16.gmra.mxu0 %vm383_vm2, %v1650_v34 }
 0x145   : > { %v1651_v39 = vpop.trf.xlu0 }
 0x146   : > { %1456 = vmatmul.msk.bf16.vlgmr.msra.gmra.mxu3 %vm383_vm2, %v1651_v39 }
 0x14d   : > { %v1652_v42 = vpop.trf.xlu0 }
 0x14e   : > { %1448 = vmatmul.msk.bf16.vlgmr.msra.gmra.mxu2 %vm383_vm2, %v1652_v42 }
 0x155   : > { %v1653_v43 = vpop.trf.xlu0 }
 0x156   : > { %1457 = vmatmul.msk.bf16.gmra.mxu3 %vm383_vm2, %v1653_v43 }
 0x15d   : > { %v1654_v44 = vpop.trf.xlu0 }
 0x15e   : > { %1449 = vmatmul.msk.bf16.gmra.mxu2 %vm383_vm2, %v1654_v44 }
 0x165   : > { %v1655_v45 = vpop.trf.xlu0 }
 0x166   : > { %1458 = vmatmul.msk.bf16.gmra.mxu3 %vm383_vm2, %v1655_v45 }
 0x16d   : > { %v1656_v46 = vpop.trf.xlu0 }
 0x16e   : > { %1450 = vmatmul.msk.bf16.gmra.mxu2 %vm383_vm2, %v1656_v46  ;;  %v1217_v46 = vld [vmem:[#allocation2] sm:$0x1] }
 0x175   : > { %v1657_v47 = vpop.trf.xlu0 }
 0x176   : > { %1459 = vmatmul.msk.bf16.gmra.mxu3 %vm383_vm2, %v1657_v47 }
 0x17d   : > { %v1658_v48 = vpop.trf.xlu0 }
 0x17e   : > { %1451 = vmatmul.msk.bf16.gmra.mxu2 %vm383_vm2, %v1658_v48 }
 0x183   : > { %v513_v13 = vpop.f32.mrf.mxu1 }
 0x184   : > { %v574_v14 = vsel %vm555_vm3, %v513_v13, -1e+30 }
 0x185   : > { %v1476_v16 = vadd.f32 -10.0, %v574_v14 }
 0x187   : > { %v654_v17 = vmul.f32 1.442695, %v1476_v16 }
 0x189   : > { %1661 = vpow2.f32 %v654_v17 }
 0x18b   : > { %v421_v18 = vpop.f32.mrf.mxu0  ;;  %v515_v19 = vpop.f32.mrf.mxu1 }
 0x18c   : > { %v575_v20 = vsel %vm555_vm3, %v515_v19, -1e+30  ;;  %v558_v24 = vsel %vm555_vm3, %v421_v18, -1e+30 }
 0x18d   : > { %v1477_v22 = vadd.f32 -10.0, %v575_v20  ;;  %v1460_v26 = vadd.f32 -10.0, %v558_v24 }
 0x18f   : > { %v1662_v23 = vpop.eup %1661  ;;  %v656_v25 = vmul.f32 1.442695, %v1477_v22  ;;  %v622_v31 = vmul.f32 1.442695, %v1460_v26  ;;  %v750_v37 = vsub.f32 %v1476_v16, %v1460_v26 }
 0x190   : > { %718 = vadd.xlane.f32.xlu0 %v1662_v23 }
 0x191   : > { %1663 = vpow2.f32 %v656_v25  ;;  %v766_v40 = vmul.f32 %v1662_v23, %v750_v37 }
 0x193   : > { %v423_v27 = vpop.f32.mrf.mxu0  ;;  %v518_v49 = vpop.f32.mrf.mxu1 }
 0x194   : > { %v559_v28 = vsel %vm555_vm3, %v423_v27, -1e+30 }
 0x195   : > { %v1461_v30 = vadd.f32 -10.0, %v559_v28 }
 0x197   : > { %v624_v32 = vmul.f32 1.442695, %v1461_v30  ;;  %v1664_v33 = vpop.eup %1663  ;;  %v751_v38 = vsub.f32 %v1477_v22, %v1461_v30 }
 0x198   : > { %720 = vadd.xlane.f32.xlu1 %v1664_v33 }
 0x199   : > { %1665 = vpow2.f32 %v624_v32  ;;  %v767_v41 = vmul.f32 %v1664_v33, %v751_v38 }
 0x19a   : > { %1667 = vpow2.f32 %v622_v31 }
 0x19b   : > { %v426_v50 = vpop.f32.mrf.mxu0  ;;  %v520_v51 = vpop.f32.mrf.mxu1 }
 0x19f   : > { %v1666_v35 = vpop.eup %1665 }
 0x1a0   : > { %v1668_v36 = vpop.eup %1667  ;;  %688 = vadd.xlane.f32.xlu2 %v1666_v35 }
 0x1a1   : > { %686 = vadd.xlane.f32.xlu1 %v1668_v36 }
 0x1a3   : > { %v428_v52 = vpop.f32.mrf.mxu0  ;;  %v523_v53 = vpop.f32.mrf.mxu1 }
 0x1a8   : > { %782 = vadd.xlane.f32.xlu2 %v766_v40 }
 0x1a9   : > { %784 = vadd.xlane.f32.xlu1 %v767_v41 }
 0x1ab   : > { %v431_v56 = vpop.f32.mrf.mxu0  ;;  %v525_v57 = vpop.f32.mrf.mxu1 }
 0x1b3   : > { %v433_v62 = vpop.f32.mrf.mxu0  ;;  %v528_v63 = vpop.f32.mrf.mxu1 }
 0x1bb   : > { %v436_v20 = vpop.f32.mrf.mxu0  ;;  %v530_v21 = vpop.f32.mrf.mxu1 }
 0x1c3   : > { %v438_v39 = vpop.f32.mrf.mxu0 }
 0x1c9   : > { %v533_v43 = vpop.f32.mrf.mxu3 }
 0x1d1   : > { %v441_v49 = vpop.f32.mrf.mxu2  ;;  %v535_v50 = vpop.f32.mrf.mxu3 }
 0x1d9   : > { %v443_v51 = vpop.f32.mrf.mxu2  ;;  %v538_v52 = vpop.f32.mrf.mxu3 }
 0x1e1   : > { %v446_v56 = vpop.f32.mrf.mxu2  ;;  %v540_v57 = vpop.f32.mrf.mxu3 }
 0x203   : > { %v719_v54 = vpop.xlane.xlu0 %718 }
 0x204   : > { %1669 = vrcp.f32 %v719_v54  ;;  %v825_v6 = vand.u32 2147483648, %v719_v54  ;;  %vm819_vm5 = vweird.f32 %v719_v54  ;;  %v823_v8 = vand.u32 2147483647, %v719_v54 }
 0x206   : > { %v826_v16 = vor.u32 1.1754944e-38, %v825_v6  ;;  %vm824_vm9 = vcmp.eq.f32.partialorder %v823_v8, 8.507059e+37 }
 0x20a   : > { %v1670_v55 = vpop.eup %1669 }
 0x20b   : > { %v815_v58 = vmul.f32 %v1670_v55, %v719_v54  ;;  %v721_v59 = vpop.xlane.xlu1 %720  ;;  %vm820_vm4 = vweird.f32 %v1670_v55 }
 0x20c   : > { %1671 = vrcp.f32 %v721_v59  ;;  %v840_v10 = vand.u32 2147483648, %v721_v59  ;;  %vm2208_vm6 = vmor %vm819_vm5, %vm820_vm4  ;;  %v838_v14 = vand.u32 2147483647, %v721_v59  ;;  %vm834_vm8 = vweird.f32 %v721_v59 }
 0x20d   : > { %v816_v60 = vsub.f32 1.0, %v815_v58  ;;  %1673 = vlog2.f32 %v719_v54  ;;  %v448_v58 = vpop.f32.mrf.mxu2 }
 0x20e   : > { %1675 = vlog2.f32 %v721_v59  ;;  %v841_v25 = vor.u32 1.1754944e-38, %v840_v10  ;;  %vm839_vm11 = vcmp.eq.f32.partialorder %v838_v14, 8.507059e+37 }
 0x20f   : > { %v817_v61 = vmul.f32 %v1670_v55, %v816_v60 }
 0x211   : > { %v818_v5 = vadd.f32 %v1670_v55, %v817_v61 }
 0x212   : > { %v1672_v0 = vpop.eup %1671 }
 0x213   : > { %v689_v1 = vpop.xlane.xlu2 %688  ;;  %v830_v3 = vmul.f32 %v1672_v0, %v721_v59  ;;  %v1674_v9 = vpop.eup %1673  ;;  %vm835_vm7 = vweird.f32 %v1672_v0  ;;  %v822_v15 = vsel %vm2208_vm6, %v1670_v55, %v818_v5 }
 0x214   : > { %v687_v4 = vpop.xlane.xlu1 %686  ;;  %1677 = vlog2.f32 %v689_v1  ;;  %v1676_v12 = vpop.eup %1675  ;;  %v1087_v18 = vmul.f32 0.6931472, %v1674_v9  ;;  %vm836_vm10 = vmor %vm834_vm8, %vm835_vm7  ;;  %v827_v27 = vsel %vm824_vm9, %v826_v16, %v822_v15 }
 0x215   : > { %1679 = vlog2.f32 %v687_v4  ;;  %v831_v7 = vsub.f32 1.0, %v830_v3  ;;  %v1089_v23 = vmul.f32 0.6931472, %v1676_v12  ;;  %v543_v59 = vpop.f32.mrf.mxu3  ;;  %v451_v60 = vpop.f32.mrf.mxu2 }
 0x217   : > { %v832_v13 = vmul.f32 %v1672_v0, %v831_v7 }
 0x219   : > { %v833_v19 = vadd.f32 %v1672_v0, %v832_v13 }
 0x21a   : > { %v1678_v17 = vpop.eup %1677 }
 0x21b   : > { %v1680_v22 = vpop.eup %1679  ;;  %v1057_v24 = vmul.f32 0.6931472, %v1678_v17  ;;  %v783_v26 = vpop.xlane.xlu2 %782  ;;  %v837_v29 = vsel %vm836_vm10, %v1672_v0, %v833_v19 }
 0x21c   : > { %v1055_v28 = vmul.f32 0.6931472, %v1680_v22  ;;  %v785_v30 = vpop.xlane.xlu1 %784  ;;  %v828_v31 = vmul.f32 %v827_v27, %v783_v26  ;;  %v842_v33 = vsel %vm839_vm11, %v841_v25, %v837_v29 }
 0x21d   : > { %v1119_v32 = vsub.f32 %v1057_v24, %v1089_v23  ;;  %v843_v35 = vmul.f32 %v842_v33, %v785_v30  ;;  %v545_v61 = vpop.f32.mrf.mxu3  ;;  %v453_v62 = vpop.f32.mrf.mxu2 }
 0x21e   : > { %v1118_v34 = vsub.f32 %v1055_v28, %v1087_v18 }
 0x21f   : > { %v1135_v36 = vadd.f32 %v1119_v32, %v843_v35 }
 0x220   : > { %v1134_v37 = vadd.f32 %v1118_v34, %v828_v31 }
 0x222   : > { %v1218_v38 = vadd.f32 %v1135_v36, %v1134_v37 }
 0x224   : > { %v1233_v40 = vrot.slane %v1218_v38, 4 }
 0x225   : > { %v548_v63 = vpop.f32.mrf.mxu3  ;;  %v456_v0 = vpop.f32.mrf.mxu2 }
 0x226   : > { %v1234_v41 = vadd.f32 %v1233_v40, %v1218_v38 }
 0x228   : > { %v1235_v42 = vrot.slane %v1234_v41, 2 }
 0x22a   : > { %v1236_v44 = vadd.f32 %v1235_v42, %v1234_v41 }
 0x22c   : > { %v1237_v45 = vrot.slane %v1236_v44, 1 }
 0x22d   : > { %v550_v1 = vpop.f32.mrf.mxu3  ;;  %v458_v2 = vpop.f32.mrf.mxu2 }
 0x22e   : > { %v1238_v47 = vadd.f32 %v1237_v45, %v1236_v44 }
 0x230   : > { %v1239_v48 = vadd.f32 %v1238_v47, %v1217_v46 }
 0x232   : > { %1241 = vst.msk [vmem:[#allocation2] sm:$0x1] %vm361_vm0, %v1239_v48 }
 0x239   : > { %v1245_v53 = vld [vmem:[#allocation2] sm:$0x1] }
 0x23a   : > { %v1246_v54 = vmul.f32 0.0625, %v1245_v53 }
 0x23c   : > { %v1248_v55 = vperm.slane %v1246_v54, 0 }
 0x23e   : > { %1250 = vperm.xlu2 %1659, %v1248_v55  }
 0x298   : > { %v1251_v3 = vpop.permute.xlu2 %1250 }
 0x299   : > { %1253 = vst [vmem:[%s355_s27] sm:$0xff] %v1251_v3 }
 0x29a   : > { %1828 = shalt.err (!%p1825_p5)
}
 0x29b   : > { %1507 = dma.vmem_to_hbm [thread:$0]  (%p2130_p6), %s1270_s24, 128, %s1272_s0, %s1255_s26  }
 0x29c PF: > { %s2333_s9 = sld [smem:[#allocation17_spill]]  ;;  %p1527_p8 = scmp.ge.s32.totalorder %s1959_s28, 2 }
 0x29e   : > { %p1523_p11 = pnand %p1527_p8, %p2142_p0 }
 0x2a0   : > { %p1524_p12 = pneg %p1523_p11 }
 0x2a2   : > { %s1283_s18 = sand.u32 1, %s2333_s9  }
 0x2a3   : > { %s1284_s4 = scalar_lea.sflag [#allocation5], %s1283_s18 }
 0x2a4   : > { %1902 = dma.done.wait (%p1524_p12), %s1284_s4, 128  }
 0x2a5   : > { %1904 = vsyncadd (%p1524_p12), %s1284_s4, 4294967168  ;;  %s26_s28 = sadd.s32 1, %s1959_s28   ;;  %s2335_s18 = sld [smem:[#allocation18_spill]] }
 0x2a6   : > { %p2236_p10 = scmp.ge.s32.totalorder %s26_s28, 6   ;;  %s2336_s19 = sld [smem:[#allocation19_spill]] }
 0x2a7   : > { %s2337_s20 = sld [smem:[#allocation27_spill]]  ;;  %s2344_s15 = smov %s1911_s16 }
 0x2a8   : > { %s2338_s12 = sld [smem:[#allocation28_spill]]  ;;  %s2345_s16 = smov %s1915_s17 }
 0x2a9   : > { %s2339_s24 = sld [smem:[#allocation22_spill]]  ;;  %s2346_s17 = smov %s2152_s1 }
 0x2aa   : > { %s2340_s25 = sld [smem:[#allocation23_spill]]  ;;  %s2347_s21 = smov %s1935_s22 }
 0x2ab   : > { %s2341_s26 = sld [smem:[#allocation25_spill]]  ;;  %s2348_s22 = smov %s1939_s23 }
 0x2ac   : > { %s2342_s27 = sld [smem:[#allocation26_spill]]  ;;  %25 = sbr.rel (!%p2236_p10) target bundleno = 18 (0x12), region = 126 }
 0x2ae   : > { %s2349_s23 = smov %s2338_s12 }
 0x2b1   :  { %1290 = vsyncpa [#allocation4], 1 }
 0x2b2   :  { %1292 = vsyncpa [#allocation4 + $0x1], 1 }
 0x2b3   :  { %1293 = vsyncpa [#allocation7], 1 }
 0x2b4   :  { %1295 = vsyncpa [#allocation7 + $0x1], 1 }
 0x2b5   :  { %1296 = vsyncpa [#allocation10], 1 }
 0x2b6   :  { %1298 = vsyncpa [#allocation10 + $0x1], 1 }
 0x2b7   :  { %1299 = vsyncpa [#allocation5], 1 }
 0x2b8   :  { %1301 = vsyncpa [#allocation5 + $0x1], 1 }

</bundles_post_ra>
